<compile_context>
chip_gen: v6e
topology: v6e:2x2x1
jax: 0.10.0
libtpu: 0.0.40
codegen_flags: <defaults>
</compile_context>

<pallas_src>
import jax
import jax.numpy as jnp
from jax.experimental import pallas as pl
from jax.experimental.pallas import tpu as pltpu

EMB_DIM = 32        # embedding dimension per head
MAX_N_TILE = 2048   # max lane-dense tile along the identity axis
EPS = 1e-8


def _cyberu_kernel(x_ref, w_ref, b_ref,
                   g1_ref, g1sq_ref, g23_ref,
                   out_ref,
                   e1_ref, e23_ref, e1sq_ref):
    D = EMB_DIM

    # ---- Grid-invariant prologue: run the three embedding heads ONCE
    # (fused [B,F] @ [F,3D] matmul) and cache all query-side quantities in
    # VMEM scratch.  The grid axis is "arbitrary" (sequential), so step 0
    # always runs before any other identity tile.
    @pl.when(pl.program_id(0) == 0)
    def _init():
        e_all = jnp.dot(x_ref[...], w_ref[...],
                        preferred_element_type=jnp.float32) + b_ref[...]
        e1 = e_all[:, :D]            # "cer"  (euclidean head)
        e2 = e_all[:, D:2 * D]       # "ber"  (cosine head)
        e3 = e_all[:, 2 * D:]        # "os"   (cosine head)

        e1_ref[...] = e1.astype(jnp.bfloat16)
        e1sq_ref[...] = jnp.sum(e1 * e1, axis=-1, keepdims=True)

        inv2 = jax.lax.rsqrt(jnp.sum(e2 * e2, axis=-1, keepdims=True) + EPS)
        inv3 = jax.lax.rsqrt(jnp.sum(e3 * e3, axis=-1, keepdims=True) + EPS)
        e23_ref[...] = jnp.concatenate([e2 * inv2, e3 * inv3],
                                       axis=-1).astype(jnp.bfloat16)

    # ---- Streamed identity tile.
    # Head 1 ("cer"): euclidean similarity, scale=1.75, offset=0.4.
    # Gallery is pre-scaled by -2 on the host, so dots1 already carries the
    # -2<e,g> term; ||g||^2 streams as an f32 row.
    dots1 = jnp.dot(e1_ref[...], g1_ref[...],
                    preferred_element_type=jnp.float32)           # [B, TN]
    d2 = jnp.maximum(e1sq_ref[...] + g1sq_ref[...] + dots1, 0.0)
    sim1 = jax.nn.sigmoid(0.7 - 1.75 * jnp.sqrt(d2))    # 1.75 * (0.4 - dist)

    # Heads 2+3 ("ber", "os"): cosine similarity mapped to [0, 1].  Query
    # embeddings and gallery columns are pre-normalized, and both heads are
    # fused into one [B,2D] @ [2D,TN] matmul whose result is cos2 + cos3.
    dots23 = jnp.dot(e23_ref[...], g23_ref[...],
                     preferred_element_type=jnp.float32)          # [B, TN]

    # torch.mean(stack([sim1, (cos2+1)/2, (cos3+1)/2]), dim=0)
    out_ref[...] = (sim1 + 0.5 * dots23 + 1.0) * (1.0 / 3.0)


def _pick_n_tile(n, max_tile=MAX_N_TILE):
    """Largest multiple of 128 that divides n and is <= max_tile."""
    t = min(n, max_tile)
    t -= t % 128
    while n % t != 0:
        t -= 128
    return t


def cyberu_sentry(x_nchw, params):
    """x_nchw: [B, C, H, W] float32 face crop.  Returns [B, N] scores in [0,1]."""
    B = x_nchw.shape[0]
    F = x_nchw.shape[1] * x_nchw.shape[2] * x_nchw.shape[3]
    D = EMB_DIM
    N = params["g1t_neg2"].shape[1]
    assert N % 128 == 0, "num_identities must be a multiple of 128"
    TN = _pick_n_tile(N)

    x_flat = x_nchw.reshape(B, F).astype(jnp.bfloat16)

    # Broadcast (grid-invariant) operands vs. operands tiled along N.
    bcast = lambda shape: pl.BlockSpec(shape, lambda j: (0, 0))
    tiled = lambda rows: pl.BlockSpec((rows, TN), lambda j: (0, j))

    return pl.pallas_call(
        _cyberu_kernel,
        out_shape=jax.ShapeDtypeStruct((B, N), jnp.float32),
        grid=(N // TN,),
        in_specs=[
            bcast((B, F)),            # x, bf16
            bcast((F, 3 * D)),        # fused head weights, bf16
            bcast((1, 3 * D)),        # fused head biases, f32
            tiled(D),                 # gallery 1 (pre-scaled by -2), bf16
            tiled(1),                 # ||g1||^2, f32
            tiled(2 * D),             # galleries 2+3 (column-normalized), bf16
        ],
        out_specs=pl.BlockSpec((B, TN), lambda j: (0, j)),
        scratch_shapes=[
            pltpu.VMEM((B, D), jnp.bfloat16),       # e1
            pltpu.VMEM((B, 2 * D), jnp.bfloat16),   # [e2/||e2||, e3/||e3||]
            pltpu.VMEM((B, 1), jnp.float32),        # ||e1||^2
        ],
        compiler_params=pltpu.CompilerParams(
            dimension_semantics=("arbitrary",)),
    )(x_flat,
      params["w_all"], params["b_all"],
      params["g1t_neg2"], params["g1_sq"], params["g23t_n"])


def make_params(key, feat_dim, emb_dim, num_ids):
    ks = jax.random.split(key, 9)

    def rnd(k, shape, scale):
        return (scale * jax.random.normal(k, shape)).astype(jnp.float32)

    # Per-head synthetic linear embedding heads: [F, D] weights, [1, D] biases.
    w1, w2, w3 = (rnd(ks[i], (feat_dim, emb_dim), 0.05) for i in range(3))
    b1, b2, b3 = (rnd(ks[3 + i], (1, emb_dim), 0.01) for i in range(3))
    # Galleries, pre-transposed to [D, N].
    g1, g2, g3 = (rnd(ks[6 + i], (emb_dim, num_ids), 1.0) for i in range(3))

    def colnorm(g):
        return g / (jnp.sqrt(jnp.sum(g * g, axis=0, keepdims=True)) + EPS)

    return {
        # Fused head weights/biases (matmul operands in bf16, bias in f32).
        "w_all": jnp.concatenate([w1, w2, w3], axis=1).astype(jnp.bfloat16),
        "b_all": jnp.concatenate([b1, b2, b3], axis=1),
        # Euclidean head: gallery pre-scaled by -2 plus precomputed ||g||^2.
        "g1t_neg2": (-2.0 * g1).astype(jnp.bfloat16),
        "g1_sq": jnp.sum(g1 * g1, axis=0, keepdims=True),
        # Cosine heads: column-normalized, stacked along D -> [2D, N], bf16.
        "g23t_n": jnp.concatenate([colnorm(g2), colnorm(g3)],
                                  axis=0).astype(jnp.bfloat16),
    }


def cyberu_reference(x_nchw, params):
    """Pure-JAX reference mirroring the kernel math (same packed params)."""
    B = x_nchw.shape[0]
    F = x_nchw.shape[1] * x_nchw.shape[2] * x_nchw.shape[3]
    D = EMB_DIM
    x = x_nchw.reshape(B, F).astype(jnp.bfloat16).astype(jnp.float32)

    w = params["w_all"].astype(jnp.float32)
    e_all = x @ w + params["b_all"]
    e1, e2, e3 = e_all[:, :D], e_all[:, D:2 * D], e_all[:, 2 * D:]

    # Euclidean head (gallery pre-scaled by -2, bf16 matmul operands).
    e1b = e1.astype(jnp.bfloat16).astype(jnp.float32)
    d2 = jnp.maximum(jnp.sum(e1 * e1, -1, keepdims=True)
                     + params["g1_sq"]
                     + e1b @ params["g1t_neg2"].astype(jnp.float32), 0.0)
    sim1 = jax.nn.sigmoid(0.7 - 1.75 * jnp.sqrt(d2))

    # Fused cosine heads (both sides pre-normalized).
    inv2 = jax.lax.rsqrt(jnp.sum(e2 * e2, -1, keepdims=True) + EPS)
    inv3 = jax.lax.rsqrt(jnp.sum(e3 * e3, -1, keepdims=True) + EPS)
    e23 = jnp.concatenate([e2 * inv2, e3 * inv3],
                          axis=-1).astype(jnp.bfloat16).astype(jnp.float32)
    dots23 = e23 @ params["g23t_n"].astype(jnp.float32)

    return (sim1 + 0.5 * dots23 + 1.0) / 3.0


if __name__ == "__main__":
    key = jax.random.PRNGKey(0)
    k_x, k_p = jax.random.split(key)

    B, C, H, W = 1, 3, 16, 16     # single cropped face, NCHW
    num_ids = 256                 # gallery identities (2 lane-dense 128 tiles)

    x = jax.random.normal(k_x, (B, C, H, W), dtype=jnp.float32)
    params = make_params(k_p, C * H * W, EMB_DIM, num_ids)

    out = jax.block_until_ready(cyberu_sentry(x, params))

    assert out.shape == (B, num_ids)
    assert bool(jnp.all(jnp.isfinite(out)))
    assert bool(jnp.all(out >= -1e-2)) and bool(jnp.all(out <= 1.0 + 1e-2))

    ref = cyberu_reference(x, params)
    assert float(jnp.max(jnp.abs(out - ref))) < 5e-2

    print("KERNEL_OK")
</pallas_src>

<mosaic_0001>
module attributes {stable_mosaic.version = 11 : i64} {
  func.func @_cyberu_kernel(%arg0: i32, %arg1: memref<1x768xbf16, #tpu.memory_space<vmem>>, %arg2: memref<768x96xbf16, #tpu.memory_space<vmem>>, %arg3: memref<1x96xf32, #tpu.memory_space<vmem>>, %arg4: memref<32x256xbf16, #tpu.memory_space<vmem>>, %arg5: memref<1x256xf32, #tpu.memory_space<vmem>>, %arg6: memref<64x256xbf16, #tpu.memory_space<vmem>>, %arg7: memref<1x256xf32, #tpu.memory_space<vmem>>, %arg8: memref<1x32xbf16, #tpu.memory_space<vmem>>, %arg9: memref<1x64xbf16, #tpu.memory_space<vmem>>, %arg10: memref<1x1xf32, #tpu.memory_space<vmem>>) attributes {dimension_semantics = [#tpu.dimension_semantics<arbitrary>], iteration_bounds = array<i64: 1>, scalar_prefetch = 0 : i64, scratch_operands = 3 : i64, tpu.core_type = #tpu.core_type<tc>, window_params = [{pipeline_mode = #tpu.pipeline_mode<synchronous>, transform_indices = @transform_0, window_bounds = array<i64: 1, 768>}, {pipeline_mode = #tpu.pipeline_mode<synchronous>, transform_indices = @transform_1, window_bounds = array<i64: 768, 96>}, {pipeline_mode = #tpu.pipeline_mode<synchronous>, transform_indices = @transform_2, window_bounds = array<i64: 1, 96>}, {transform_indices = @transform_3, window_bounds = array<i64: 32, 256>}, {transform_indices = @transform_4, window_bounds = array<i64: 1, 256>}, {transform_indices = @transform_5, window_bounds = array<i64: 64, 256>}, {transform_indices = @transform_6, window_bounds = array<i64: 1, 256>}]} {
    %c0_i32 = arith.constant 0 : i32
    %0 = arith.cmpi eq, %arg0, %c0_i32 : i32
    %1 = arith.extui %0 : i1 to i32
    %c0_i32_0 = arith.constant 0 : i32
    %2 = arith.cmpi ne, %1, %c0_i32_0 : i32
    scf.if %2 {
      %c0_22 = arith.constant 0 : index
      %c0_23 = arith.constant 0 : index
      %34 = vector.load %arg1[%c0_22, %c0_23] : memref<1x768xbf16, #tpu.memory_space<vmem>>, vector<1x768xbf16>
      %c0_24 = arith.constant 0 : index
      %c0_25 = arith.constant 0 : index
      %35 = vector.load %arg2[%c0_24, %c0_25] : memref<768x96xbf16, #tpu.memory_space<vmem>>, vector<768x96xbf16>
      %cst_26 = arith.constant dense<0.000000e+00> : vector<1x96xf32>
      %36 = tpu.matmul %34, %35, %cst_26 {dimension_numbers = #tpu.dot_dimension_numbers<[1], [0], [0], [1], [0, 0, 1, 1], [], []>} : vector<1x768xbf16>, vector<768x96xbf16>, vector<1x96xf32> -> vector<1x96xf32>
      %c0_27 = arith.constant 0 : index
      %c0_28 = arith.constant 0 : index
      %37 = vector.load %arg3[%c0_27, %c0_28] : memref<1x96xf32, #tpu.memory_space<vmem>>, vector<1x96xf32>
      %38 = arith.addf %36, %37 : vector<1x96xf32>
      %39 = vector.extract_strided_slice %38 {offsets = [0, 0], sizes = [1, 32], strides = [1, 1]} : vector<1x96xf32> to vector<1x32xf32>
      %40 = vector.extract_strided_slice %38 {offsets = [0, 32], sizes = [1, 32], strides = [1, 1]} : vector<1x96xf32> to vector<1x32xf32>
      %41 = vector.extract_strided_slice %38 {offsets = [0, 64], sizes = [1, 32], strides = [1, 1]} : vector<1x96xf32> to vector<1x32xf32>
      %42 = arith.truncf %39 : vector<1x32xf32> to vector<1x32xbf16>
      %c0_29 = arith.constant 0 : index
      %c0_30 = arith.constant 0 : index
      %43 = vector.load %arg8[%c0_29, %c0_30] : memref<1x32xbf16, #tpu.memory_space<vmem>>, vector<1x32xbf16>
      tpu.vector_store %arg8[%c0_29, %c0_30], %42 {strides = array<i32>} : memref<1x32xbf16, #tpu.memory_space<vmem>>, vector<1x32xbf16>,
      %44 = arith.mulf %39, %39 : vector<1x32xf32>
      %cst_31 = arith.constant dense<0.000000e+00> : vector<1xf32>
      %45 = vector.multi_reduction <add>, %44, %cst_31 [1] : vector<1x32xf32> to vector<1xf32>
      %46 = vector.shape_cast %45 : vector<1xf32> to vector<1x1xf32>
      %c0_32 = arith.constant 0 : index
      %c0_33 = arith.constant 0 : index
      %47 = vector.load %arg10[%c0_32, %c0_33] : memref<1x1xf32, #tpu.memory_space<vmem>>, vector<1x1xf32>
      tpu.vector_store %arg10[%c0_32, %c0_33], %46 {strides = array<i32>} : memref<1x1xf32, #tpu.memory_space<vmem>>, vector<1x1xf32>,
      %48 = arith.mulf %40, %40 : vector<1x32xf32>
      %cst_34 = arith.constant dense<0.000000e+00> : vector<1xf32>
      %49 = vector.multi_reduction <add>, %48, %cst_34 [1] : vector<1x32xf32> to vector<1xf32>
      %50 = vector.shape_cast %49 : vector<1xf32> to vector<1x1xf32>
      %cst_35 = arith.constant 9.99999993E-9 : f32
      %51 = vector.broadcast %cst_35 : f32 to vector<1x1xf32>
      %52 = arith.addf %50, %51 : vector<1x1xf32>
      %53 = math.rsqrt %52 : vector<1x1xf32>
      %54 = arith.mulf %41, %41 : vector<1x32xf32>
      %cst_36 = arith.constant dense<0.000000e+00> : vector<1xf32>
      %55 = vector.multi_reduction <add>, %54, %cst_36 [1] : vector<1x32xf32> to vector<1xf32>
      %56 = vector.shape_cast %55 : vector<1xf32> to vector<1x1xf32>
      %cst_37 = arith.constant 9.99999993E-9 : f32
      %57 = vector.broadcast %cst_37 : f32 to vector<1x1xf32>
      %58 = arith.addf %56, %57 : vector<1x1xf32>
      %59 = math.rsqrt %58 : vector<1x1xf32>
      %60 = vector.broadcast %53 : vector<1x1xf32> to vector<1x32xf32>
      %61 = arith.mulf %40, %60 : vector<1x32xf32>
      %62 = vector.broadcast %59 : vector<1x1xf32> to vector<1x32xf32>
      %63 = arith.mulf %41, %62 : vector<1x32xf32>
      %64 = tpu.concatenate %61, %63 in 1 : vector<1x32xf32>, vector<1x32xf32> -> vector<1x64xf32>
      %65 = arith.truncf %64 : vector<1x64xf32> to vector<1x64xbf16>
      %c0_38 = arith.constant 0 : index
      %c0_39 = arith.constant 0 : index
      %66 = vector.load %arg9[%c0_38, %c0_39] : memref<1x64xbf16, #tpu.memory_space<vmem>>, vector<1x64xbf16>
      tpu.vector_store %arg9[%c0_38, %c0_39], %65 {strides = array<i32>} : memref<1x64xbf16, #tpu.memory_space<vmem>>, vector<1x64xbf16>,
    } else {
    }
    %c0 = arith.constant 0 : index
    %c0_1 = arith.constant 0 : index
    %3 = vector.load %arg8[%c0, %c0_1] : memref<1x32xbf16, #tpu.memory_space<vmem>>, vector<1x32xbf16>
    %c0_2 = arith.constant 0 : index
    %c0_3 = arith.constant 0 : index
    %4 = vector.load %arg4[%c0_2, %c0_3] : memref<32x256xbf16, #tpu.memory_space<vmem>>, vector<32x256xbf16>
    %cst = arith.constant dense<0.000000e+00> : vector<1x256xf32>
    %5 = tpu.matmul %3, %4, %cst {dimension_numbers = #tpu.dot_dimension_numbers<[1], [0], [0], [1], [0, 0, 1, 1], [], []>} : vector<1x32xbf16>, vector<32x256xbf16>, vector<1x256xf32> -> vector<1x256xf32>
    %c0_4 = arith.constant 0 : index
    %c0_5 = arith.constant 0 : index
    %6 = vector.load %arg10[%c0_4, %c0_5] : memref<1x1xf32, #tpu.memory_space<vmem>>, vector<1x1xf32>
    %c0_6 = arith.constant 0 : index
    %c0_7 = arith.constant 0 : index
    %7 = vector.load %arg5[%c0_6, %c0_7] : memref<1x256xf32, #tpu.memory_space<vmem>>, vector<1x256xf32>
    %8 = vector.broadcast %6 : vector<1x1xf32> to vector<1x256xf32>
    %9 = arith.addf %8, %7 : vector<1x256xf32>
    %10 = arith.addf %9, %5 : vector<1x256xf32>
    %cst_8 = arith.constant 0.000000e+00 : f32
    %11 = vector.broadcast %cst_8 : f32 to vector<1x256xf32>
    %12 = arith.maximumf %10, %11 : vector<1x256xf32>
    %13 = math.sqrt %12 : vector<1x256xf32>
    %cst_9 = arith.constant 1.750000e+00 : f32
    %14 = vector.broadcast %cst_9 : f32 to vector<1x256xf32>
    %15 = arith.mulf %14, %13 : vector<1x256xf32>
    %cst_10 = arith.constant 0.699999988 : f32
    %16 = vector.broadcast %cst_10 : f32 to vector<1x256xf32>
    %17 = arith.subf %16, %15 : vector<1x256xf32>
    %18 = arith.negf %17 : vector<1x256xf32>
    %19 = math.exp %18 : vector<1x256xf32>
    %cst_11 = arith.constant 1.000000e+00 : f32
    %20 = vector.broadcast %cst_11 : f32 to vector<1x256xf32>
    %21 = arith.addf %20, %19 : vector<1x256xf32>
    %22 = arith.divf %20, %21 : vector<1x256xf32>
    %c0_12 = arith.constant 0 : index
    %c0_13 = arith.constant 0 : index
    %23 = vector.load %arg9[%c0_12, %c0_13] : memref<1x64xbf16, #tpu.memory_space<vmem>>, vector<1x64xbf16>
    %c0_14 = arith.constant 0 : index
    %c0_15 = arith.constant 0 : index
    %24 = vector.load %arg6[%c0_14, %c0_15] : memref<64x256xbf16, #tpu.memory_space<vmem>>, vector<64x256xbf16>
    %cst_16 = arith.constant dense<0.000000e+00> : vector<1x256xf32>
    %25 = tpu.matmul %23, %24, %cst_16 {dimension_numbers = #tpu.dot_dimension_numbers<[1], [0], [0], [1], [0, 0, 1, 1], [], []>} : vector<1x64xbf16>, vector<64x256xbf16>, vector<1x256xf32> -> vector<1x256xf32>
    %cst_17 = arith.constant 5.000000e-01 : f32
    %26 = vector.broadcast %cst_17 : f32 to vector<1x256xf32>
    %27 = arith.mulf %26, %25 : vector<1x256xf32>
    %28 = arith.addf %22, %27 : vector<1x256xf32>
    %cst_18 = arith.constant 1.000000e+00 : f32
    %29 = vector.broadcast %cst_18 : f32 to vector<1x256xf32>
    %30 = arith.addf %28, %29 : vector<1x256xf32>
    %cst_19 = arith.constant 0.333333343 : f32
    %31 = vector.broadcast %cst_19 : f32 to vector<1x256xf32>
    %32 = arith.mulf %30, %31 : vector<1x256xf32>
    %c0_20 = arith.constant 0 : index
    %c0_21 = arith.constant 0 : index
    %33 = vector.load %arg7[%c0_20, %c0_21] : memref<1x256xf32, #tpu.memory_space<vmem>>, vector<1x256xf32>
    tpu.vector_store %arg7[%c0_20, %c0_21], %32 {strides = array<i32>} : memref<1x256xf32, #tpu.memory_space<vmem>>, vector<1x256xf32>,
    return
  }
  func.func @transform_0(%arg0: i32) -> (i32, i32) {
    %c0_i32 = arith.constant 0 : i32
    %c0_i32_0 = arith.constant 0 : i32
    %c0_i32_1 = arith.constant 0 : i32
    return %c0_i32, %c0_i32_0 : i32, i32
  }
  func.func @transform_1(%arg0: i32) -> (i32, i32) {
    %c0_i32 = arith.constant 0 : i32
    %c0_i32_0 = arith.constant 0 : i32
    %c0_i32_1 = arith.constant 0 : i32
    return %c0_i32, %c0_i32_0 : i32, i32
  }
  func.func @transform_2(%arg0: i32) -> (i32, i32) {
    %c0_i32 = arith.constant 0 : i32
    %c0_i32_0 = arith.constant 0 : i32
    %c0_i32_1 = arith.constant 0 : i32
    return %c0_i32, %c0_i32_0 : i32, i32
  }
  func.func @transform_3(%arg0: i32) -> (i32, i32) {
    %c0_i32 = arith.constant 0 : i32
    %c0_i32_0 = arith.constant 0 : i32
    return %c0_i32, %arg0 : i32, i32
  }
  func.func @transform_4(%arg0: i32) -> (i32, i32) {
    %c0_i32 = arith.constant 0 : i32
    %c0_i32_0 = arith.constant 0 : i32
    return %c0_i32, %arg0 : i32, i32
  }
  func.func @transform_5(%arg0: i32) -> (i32, i32) {
    %c0_i32 = arith.constant 0 : i32
    %c0_i32_0 = arith.constant 0 : i32
    return %c0_i32, %arg0 : i32, i32
  }
  func.func @transform_6(%arg0: i32) -> (i32, i32) {
    %c0_i32 = arith.constant 0 : i32
    %c0_i32_0 = arith.constant 0 : i32
    return %c0_i32, %arg0 : i32, i32
  }
}

</mosaic_0001>

<bundles_post_ra>
// kernel: tpu_custom_call.1
= control target key start
LH: loop header
LB: loop body
LE: loop exit
PB: predicated region body
PF: predicated region fallthrough
CT: control target
= control target key end

     0   :  { %v132_v29 = vlaneseq  ;;  %v1130_v33 = vmov 1966171168   ;;  %s1390_s0 = inlined_call_operand.vmem [shape: bf16[1,768], index: 0, kind: input, shape index: {}]   ;;  %s1391_s1 = inlined_call_operand.vmem [shape: bf16[768,96], index: 1, kind: input, shape index: {}]   ;;  %s1392_s2 = inlined_call_operand.vmem [shape: f32[1,96], index: 2, kind: input, shape index: {}]   ;;  %s1393_s3 = inlined_call_operand.vmem [shape: bf16[32,256], index: 3, kind: input, shape index: {}]   ;;  %s1394_s4 = inlined_call_operand.vmem [shape: f32[1,256], index: 4, kind: input, shape index: {}]   ;;  %s1395_s5 = inlined_call_operand.vmem [shape: bf16[64,256], index: 5, kind: input, shape index: {}]   ;;  %s1396_s6 = inlined_call_operand.hbm [shape: f32[1,256], index: 6, kind: output, shape index: {}]  }
   0x1   :  { %v1031_v0 = vld [vmem:[%s1391_s1 + $0x78] sm:$0xff]   ;;  %v1035_v4 = vld [vmem:[%s1391_s1 + $0x70] sm:$0xff]   ;;  %v1039_v8 = vld [vmem:[%s1391_s1 + $0x68] sm:$0xff]   ;;  %v130_v34 = vunpack.c.l.s4 %v1130_v33 }
   0x2   :  { %v1032_v1 = vld [vmem:[%s1391_s1 + $0x38] sm:$0xff]   ;;  %954 = vmatprep.subr.bf16.mxu0 %v1031_v0  ;;  %v1036_v5 = vld [vmem:[%s1391_s1 + $0x30] sm:$0xff]   ;;  %v1040_v9 = vld [vmem:[%s1391_s1 + $0x28] sm:$0xff]   ;;  %v1267_v35 = vshrl.u32 %v132_v29, 7 }
   0x3   :  { %v1033_v2 = vld [vmem:[%s1391_s1 + $0xf8] sm:$0xff]   ;;  %955 = vmatpush3.bf16.msra.mxu0 %v1032_v1  ;;  %v1037_v6 = vld [vmem:[%s1391_s1 + $0xf0] sm:$0xff]   ;;  %v1041_v10 = vld [vmem:[%s1391_s1 + $0xe8] sm:$0xff]   ;;  %v131_v39 = vunpack.c.0.s8 %v130_v34 }
   0x4   :  { %v1034_v3 = vld [vmem:[%s1391_s1 + $0xb8] sm:$0xff]   ;;  %976 = vmatprep.subr.bf16.mxu1 %v1033_v2  ;;  %956 = vmatprep.subr.bf16.mxu0 %v1035_v4  ;;  %v1038_v7 = vld [vmem:[%s1391_s1 + $0xb0] sm:$0xff]   ;;  %v1042_v11 = vld [vmem:[%s1391_s1 + $0xa8] sm:$0xff]  }
   0x5   :  { %977 = vmatpush3.bf16.msra.mxu1 %v1034_v3  ;;  %v1043_v12 = vld [vmem:[%s1391_s1 + $0x60] sm:$0xff]   ;;  %v1047_v16 = vld [vmem:[%s1391_s1 + $0x58] sm:$0xff]   ;;  %v1051_v20 = vld [vmem:[%s1391_s1 + $0x50] sm:$0xff]   ;;  %v1276_v40 = vsub.s32 %v131_v39, %v1267_v35 }
   0x6   :  { %978 = vmatprep.subr.bf16.mxu1 %v1037_v6  ;;  %v1044_v13 = vld [vmem:[%s1391_s1 + $0x20] sm:$0xff]   ;;  %v1048_v17 = vld [vmem:[%s1391_s1 + $0x18] sm:$0xff]   ;;  %v1052_v21 = vld [vmem:[%s1391_s1 + $0x10] sm:$0xff]  }
   0x7   :  { %957 = vmatpush3.bf16.msra.mxu0 %v1036_v5  ;;  %v1045_v14 = vld [vmem:[%s1391_s1 + $0xe0] sm:$0xff]   ;;  %v1049_v18 = vld [vmem:[%s1391_s1 + $0xd8] sm:$0xff]   ;;  %v1053_v22 = vld [vmem:[%s1391_s1 + $0xd0] sm:$0xff]  }
   0x8   :  { %958 = vmatprep.subr.bf16.mxu0 %v1039_v8  ;;  %v1046_v15 = vld [vmem:[%s1391_s1 + $0xa0] sm:$0xff]   ;;  %v1050_v19 = vld [vmem:[%s1391_s1 + $0x98] sm:$0xff]   ;;  %v1054_v23 = vld [vmem:[%s1391_s1 + $0x90] sm:$0xff]  }
   0x9   :  { %979 = vmatpush3.bf16.msra.mxu1 %v1038_v7  ;;  %v1055_v24 = vld [vmem:[%s1391_s1 + $0x48] sm:$0xff]   ;;  %v1059_v28 = vld [vmem:[%s1391_s1 + $0x40] sm:$0xff]   ;;  %v1064_v37 = vld [vmem:[%s1391_s1 + $0x178] sm:$0xff]  }
   0xa   :  { %980 = vmatprep.subr.bf16.mxu1 %v1041_v10  ;;  %v1056_v25 = vld [vmem:[%s1391_s1 + $0x8] sm:$0xff]   ;;  %v1060_v30 = vld [vmem:[%s1391_s1] sm:$0xff]   ;;  %v1065_v47 = vld [vmem:[%s1391_s1 + $0x138] sm:$0xff]  }
   0xb   :  { %959 = vmatpush3.bf16.msra.mxu0 %v1040_v9  ;;  %v1057_v26 = vld [vmem:[%s1391_s1 + $0xc8] sm:$0xff]   ;;  %v1061_v31 = vld [vmem:[%s1391_s1 + $0xc0] sm:$0xff]   ;;  %v1066_v49 = vld [vmem:[%s1391_s1 + $0x170] sm:$0xff]  }
   0xc   :  { %960 = vmatprep.subr.bf16.mxu0 %v1043_v12  ;;  %v1058_v27 = vld [vmem:[%s1391_s1 + $0x88] sm:$0xff]   ;;  %v29_v32 = vld [vmem:[%s1390_s0] sm:$0x3f]  ;;  %v1067_v52 = vld [vmem:[%s1391_s1 + $0x130] sm:$0xff]  }
   0xd   :  { %981 = vmatpush3.bf16.msra.mxu1 %v1042_v11  ;;  %v1063_v36 = vld [vmem:[%s1391_s1 + $0x80] sm:$0xff]   ;;  %v128_v38 = vcombine.high %v29_v32, %v29_v32  ;;  %v135_v41 = vrot.slane %v29_v32, %v1276_v40  ;;  %v1068_v53 = vld [vmem:[%s1391_s1 + $0x168] sm:$0xff]  }
   0xe   :  { %982 = vmatprep.subr.bf16.mxu1 %v1045_v14  ;;  %v1069_v54 = vld [vmem:[%s1391_s1 + $0x128] sm:$0xff]   ;;  %v1070_v55 = vld [vmem:[%s1391_s1 + $0x160] sm:$0xff]  }
   0xf   :  { %961 = vmatpush3.bf16.msra.mxu0 %v1044_v13  ;;  %v142_v42 = vrot.slane %v128_v38, %v1276_v40  ;;  %v143_v43 = vcombine.high %v135_v41, %v135_v41  ;;  %v151_v44 = vrot.slane %v135_v41, %v1276_v40 }
  0x10   :  { %962 = vmatprep.subr.bf16.mxu0 %v1047_v16 }
  0x11   :  { %983 = vmatpush3.bf16.msra.mxu1 %v1046_v15  ;;  %v144_v45 = vcombine.high %v142_v42, %v142_v42  ;;  %v165_v46 = vrot.slane %v143_v43, %v1276_v40  ;;  %v173_v48 = vcombine.high %v151_v44, %v151_v44 }
  0x12   :  { %984 = vmatprep.subr.bf16.mxu1 %v1049_v18 }
  0x13   :  { %963 = vmatpush3.bf16.msra.mxu0 %v1048_v17  ;;  %501 = vmatprep.mubr.bf16.mxu0 %v165_v46  ;;  %v174_v50 = vcombine.high %v165_v46, %v165_v46  ;;  %v172_v51 = vrot.slane %v144_v45, %v1276_v40 }
  0x14   :  { %964 = vmatprep.subr.bf16.mxu0 %v1051_v20 }
  0x15   :  { %985 = vmatpush3.bf16.msra.mxu1 %v1050_v19  ;;  %541 = vmatprep.mubr.bf16.mxu1 %v174_v50 }
  0x16   :  { %986 = vmatprep.subr.bf16.mxu1 %v1053_v22 }
  0x17   :  { %965 = vmatpush3.bf16.msra.mxu0 %v1052_v21 }
  0x18   :  { %966 = vmatprep.subr.bf16.mxu0 %v1055_v24 }
  0x19   :  { %987 = vmatpush3.bf16.msra.mxu1 %v1054_v23 }
  0x1a   :  { %988 = vmatprep.subr.bf16.mxu1 %v1057_v26 }
  0x1b   :  { %967 = vmatpush3.bf16.msra.mxu0 %v1056_v25 }
  0x1c   :  { %968 = vmatprep.subr.bf16.mxu0 %v1059_v28 }
  0x1d   :  { %989 = vmatpush3.bf16.msra.mxu1 %v1058_v27 }
  0x1e   :  { %990 = vmatprep.subr.bf16.mxu1 %v1061_v31 }
  0x1f   :  { %969 = vmatpush3.bf16.msra.mxu0 %v1060_v30 }
  0x20   :  { %998 = vmatprep.subr.bf16.mxu0 %v1064_v37 }
  0x21   :  { %991 = vmatpush3.bf16.msra.mxu1 %v1063_v36 }
  0x22   :  { %502 = vmatmul.mubr.bf16.vlgmr.msra.gmra.mxu0 %v151_v44 }
  0x23   :  { %999 = vmatpush3.bf16.msra.mxu0 %v1065_v47  ;;  %581 = vmatprep.mubr.bf16.mxu0 %v172_v51 }
  0x24   :  { %542 = vmatmul.mubr.bf16.vlgmr.msra.gmra.mxu1 %v173_v48  ;;  %1000 = vmatprep.subr.bf16.mxu0 %v1066_v49 }
  0x27   :  { %1001 = vmatpush3.bf16.msra.mxu0 %v1067_v52 }
  0x28   :  { %1002 = vmatprep.subr.bf16.mxu0 %v1068_v53 }
  0x29   :  { %11 = vsyncpa [#allocation6], 0  ;;  %v1071_v56 = vld [vmem:[%s1391_s1 + $0x120] sm:$0xff]   ;;  %v1072_v57 = vld [vmem:[%s1391_s1 + $0x158] sm:$0xff]   ;;  %v158_v1 = vrot.slane %v142_v42, %v1276_v40  ;;  %v1131_v6 = vmov 0   ;;  %vm590_vm0 = vcmask 253952  }
  0x2a   :  { %v1073_v58 = vld [vmem:[%s1391_s1 + $0x118] sm:$0xff]   ;;  %v1074_v59 = vld [vmem:[%s1391_s1 + $0x150] sm:$0xff]   ;;  %v1076_v61 = vld [vmem:[%s1391_s1 + $0x148] sm:$0xff]   ;;  %699 = vmatprep.mubr.bf16.mxu1 %v1131_v6  ;;  %1030 = vset.pattern.permute.xlu0 %v1131_v6  ;;  %vm591_vm1 = vsmask.f32 256  ;;  %vm630_vm3 = vcmask 261120  }
  0x2b   :  { %1003 = vmatpush3.bf16.msra.mxu0 %v1069_v54  ;;  %v1075_v60 = vld [vmem:[%s1391_s1 + $0x110] sm:$0xff]   ;;  %v1077_v62 = vld [vmem:[%s1391_s1 + $0x108] sm:$0xff]   ;;  %v1078_v63 = vld [vmem:[%s1391_s1 + $0x140] sm:$0xff]   ;;  %vm601_vm4 = vcmask 0   ;;  %vm633_vm5 = vcmask 516096   ;;  %vm804_vm7 = vcmask 523264  }
  0x2c   :  { %1004 = vmatprep.subr.bf16.mxu0 %v1070_v55  ;;  %v1079_v0 = vld [vmem:[%s1391_s1 + $0x100] sm:$0xff]   ;;  %v1082_v2 = vld [vmem:[%s1393_s3 + $0x14] ss:$8 sps:$4 sm:$0xff]   ;;  %v1080_v3 = vld [vmem:[%s1393_s3 + $0x10] ss:$8 sps:$4 sm:$0xff]   ;;  %vm874_vm10 = vcmp.lt.s32.totalorder %v132_v29, 256 }
  0x2d   :  { %679 = vmatprep.subr.bf16.mxu1 %v1082_v2  ;;  %v1085_v4 = vld [vmem:[%s1393_s3 + $0x4] ss:$8 sps:$4 sm:$0xff]   ;;  %v1083_v5 = vld [vmem:[%s1393_s3] ss:$8 sps:$4 sm:$0xff]   ;;  %vm592_vm2 = vmand %vm590_vm0, %vm591_vm1  ;;  %s1132_s3 = smov 96  }
  0x2e   :  { %680 = vmatpush1.bf16.msra.mxu1 %v1080_v3  ;;  %v126_v16 = vld [vmem:[%s1392_s2] sm:$0x1]  ;;  %s1133_s2 = smov 64   ;;  %v1086_v38 = vld [vmem:[%s1395_s5 + $0x30] ss:$8 sps:$4 sm:$0xff]   ;;  %vm634_vm6 = vmand %vm633_vm5, %vm591_vm1 }
  0x2f   :  { %1005 = vmatpush3.bf16.msra.mxu0 %v1071_v56  ;;  %681 = vmatprep.subr.bf16.mxu1 %v1085_v4  ;;  %v593_v25 = vld [vmem:[#allocation2] sm:$0x1]  ;;  %v1088_v39 = vld [vmem:[%s1395_s5 + $0x34] ss:$8 sps:$4 sm:$0xff]   ;;  %v1091_v51 = vld [vmem:[%s1395_s5 + $0x24] ss:$8 sps:$4 sm:$0xff]  }
  0x30   :  { %1006 = vmatprep.subr.bf16.mxu0 %v1072_v57  ;;  %v1089_v52 = vld [vmem:[%s1395_s5 + $0x20] ss:$8 sps:$4 sm:$0xff]   ;;  %v1094_v53 = vld [vmem:[%s1395_s5 + $0x14] ss:$8 sps:$4 sm:$0xff]   ;;  %v1092_v54 = vld [vmem:[%s1395_s5 + $0x10] ss:$8 sps:$4 sm:$0xff]  }
  0x31   :  { %v1097_v56 = vld [vmem:[%s1395_s5 + $0x4] ss:$8 sps:$4 sm:$0xff]   ;;  %v1095_v57 = vld [vmem:[%s1395_s5] ss:$8 sps:$4 sm:$0xff]  }
  0x32   :  { %682 = vmatpush1.bf16.msra.mxu1 %v1083_v5  ;;  %v635_v2 = vld [vmem:[#allocation3] sm:$0x1] }
  0x33   :  { %1007 = vmatpush3.bf16.msra.mxu0 %v1073_v58  ;;  %816 = vmatprep.subr.bf16.mxu1 %v1088_v39 }
  0x34   :  { %1008 = vmatprep.subr.bf16.mxu0 %v1074_v59 }
  0x37   :  { %1009 = vmatpush3.bf16.msra.mxu0 %v1075_v60 }
  0x38   :  { %1010 = vmatprep.subr.bf16.mxu0 %v1076_v61 }
  0x3b   :  { %1011 = vmatpush3.bf16.msra.mxu0 %v1077_v62 }
  0x3c   :  { %1012 = vmatprep.subr.bf16.mxu0 %v1078_v63 }
  0x3f   :  { %1013 = vmatpush3.bf16.msra.mxu0 %v1079_v0 }
  0x42   :  { %582 = vmatmul.mubr.bf16.vlgmr.msra.gmra.mxu0 %v158_v1 }
  0xe2   :  { %v970_v7 = vpop.f32.mrf.mxu0 }
  0xe4   :  { %v971_v8 = vpop.f32.mrf.mxu0  ;;  %v992_v9 = vpop.f32.mrf.mxu1 }
  0xe5   :  { %v972_v15 = vadd.f32 %v971_v8, %v970_v7  ;;  %v717_v7 = vsub.s32 0, %v1267_v35 }
  0xe6   :  { %v973_v10 = vpop.f32.mrf.mxu0  ;;  %v993_v11 = vpop.f32.mrf.mxu1 }
  0xe7   :  { %v504_v17 = vadd.f32 %v972_v15, %v126_v16  ;;  %v994_v18 = vadd.f32 %v993_v11, %v992_v9  ;;  %v709_v10 = vld [vmem:[%s1394_s4] sm:$0x3]  ;;  %s1134_s4 = smov [#allocation5]  }
  0xe8   :  { %v974_v12 = vpop.f32.mrf.mxu0  ;;  %v995_v13 = vpop.f32.mrf.mxu1  ;;  %s883_s22 = sshll.u32 %s1134_s4, 4  ;;  %s884_s22 = int_to_ptr.vmem [resolvable:$true] %s883_s22 }
  0xe9   :  { %v544_v21 = vadd.f32 %v994_v18, %v504_v17  ;;  %s1108_s23 = scalar_lea.vmem %s884_s22, 32  ;;  %p1113_p1 = scmp.lt.s32.totalorder %s884_s22, %s884_s22 }
  0xea   :  { %v996_v14 = vpop.f32.mrf.mxu1  ;;  %p1109_p0 = scmp.ne.s32.totalorder %s884_s22, %s1108_s23  ;;  %p1114_p2 = scmp.lt.s32.totalorder %s1108_s23, %s1108_s23 }
  0xec   :  { %p1115_p3 = por %p1114_p2, %p1113_p1 }
  0xee   :  { %p1116_p4 = pnand %p1115_p3, %p1109_p0 }
 0x102   :  { %v1014_v19 = vpop.f32.mrf.mxu0 }
 0x104   :  { %v1015_v20 = vpop.f32.mrf.mxu0 }
 0x105   :  { %v1016_v22 = vadd.f32 %v1015_v20, %v1014_v19 }
 0x106   :  { %v1017_v23 = vpop.f32.mrf.mxu0 }
 0x107   :  { %v584_v24 = vadd.f32 %v1016_v22, %v544_v21 }
 0x108   :  { %v1018_v26 = vpop.f32.mrf.mxu0 }
 0x109   :  { %v589_v27 = vpack.c.bf16 %v584_v24, %v584_v24  ;;  %v596_v28 = vmul.f32 %v584_v24, %v584_v24 }
 0x10b   :  { %v594_v30 = vsel %vm592_vm2, %v589_v27, %v593_v25  ;;  %604 = vrot.lane.b32.xlu0 %v596_v28, %s1132_s3  ;;  %v598_v37 = vsel %vm590_vm0, %v596_v28, 0.0 }
 0x10c   :  { %595 = vst [vmem:[#allocation2] sm:$0x1] %v594_v30 }
 0x10f   :  { %612 = vrot.lane.b32.xlu0 %v596_v28, %s1133_s2 }
 0x113   :  { %v638_v31 = vld [vmem:[#allocation2] sm:$0x1] }
 0x114   :  { %943 = vmatmul.mubr.msk.bf16.vlgmr.msra.gmra.mxu1 %vm630_vm3, %v638_v31 }
 0x115   :  { %840 = vmatprep.mubr.bf16.mxu1 %v1131_v6  ;;  %817 = vmatpush1.bf16.msra.mxu1 %v1086_v38 }
 0x116   :  { %818 = vmatprep.subr.bf16.mxu1 %v1091_v51 }
 0x119   :  { %819 = vmatpush1.bf16.msra.mxu1 %v1089_v52 }
 0x11a   :  { %820 = vmatprep.subr.bf16.mxu1 %v1094_v53 }
 0x11d   :  { %821 = vmatpush1.bf16.msra.mxu1 %v1092_v54 }
 0x11e   :  { %822 = vmatprep.subr.bf16.mxu1 %v1097_v56 }
 0x121   :  { %823 = vmatpush1.bf16.msra.mxu1 %v1095_v57 }
 0x17d   :  { %v605_v32 = vpop.permute.xlu0 %604 }
 0x17e   :  { %v607_v33 = vsel %vm590_vm0, %v605_v32, 0.0 }
 0x17f   :  { %608 = vadd.xlane.f32.xlu1 %v607_v33 }
 0x181   :  { %v613_v34 = vpop.permute.xlu0 %612 }
 0x182   :  { %v615_v36 = vsel %vm590_vm0, %v613_v34, 0.0 }
 0x183   :  { %616 = vadd.xlane.f32.xlu1 %v615_v36 }
 0x187   :  { %599 = vadd.xlane.f32.xlu1 %v598_v37 }
 0x1d4   :  { %v701_v41 = vpop.f32.mrf.mxu1 }
 0x1d6   :  { %v703_v42 = vpop.f32.mrf.mxu1 }
 0x1d7   :  { %v722_v43 = vcombine.low %v701_v41, %v703_v42 }
 0x1d8   :  { %v705_v44 = vpop.f32.mrf.mxu1 }
 0x1d9   :  { %v729_v11 = vrot.slane %v722_v43, %v1276_v40 }
 0x1da   :  { %v706_v45 = vpop.f32.mrf.mxu1 }
 0x1db   :  { %v736_v13 = vrot.slane %v729_v11, %v1276_v40 }
 0x208   :  { %v609_v46 = vpop.xlane.xlu1 %608 }
 0x209   :  { %v610_v47 = vadd.f32 1e-08, %v609_v46 }
 0x20b   :  { %1098 = vrsqrt.f32 %v610_v47 }
 0x20c   :  { %v617_v48 = vpop.xlane.xlu1 %616 }
 0x20d   :  { %v618_v49 = vadd.f32 1e-08, %v617_v48 }
 0x20f   :  { %1100 = vrsqrt.f32 %v618_v49 }
 0x210   :  { %v600_v50 = vpop.xlane.xlu1 %599 }
 0x211   :  { %602 = vst.msk [vmem:[#allocation4] sm:$0x1] %vm601_vm4, %v600_v50 }
 0x218   :  { %v1099_v55 = vpop.eup %1098  ;;  %v708_v62 = vld [vmem:[#allocation4] sm:$0x1] }
 0x219   :  { %v620_v59 = vmul.f32 %v1099_v55, %v584_v24 }
 0x21c   :  { %v1101_v58 = vpop.eup %1100 }
 0x21d   :  { %v621_v60 = vmul.f32 %v1101_v58, %v584_v24 }
 0x21f   :  { %v1025_v61 = vpack.i.bf16 %v621_v60, %v620_v59 }
 0x221   :  { %1026 = vrot.lane.b32.xlu0 %v1025_v61, %s1132_s3 }
 0x225   :  { %712 = vperm.xlu0 %1030, %v708_v62  }
 0x293   :  { %v1027_v63 = vpop.permute.xlu0 %1026 }
 0x294   :  { %v1029_v0 = vunpack.i.h.bf16 %v1027_v63  ;;  %v1028_v1 = vunpack.i.l.bf16 %v1027_v63 }
 0x296   :  { %v631_v3 = vsel %vm630_vm3, %v1028_v1, %v1029_v0 }
 0x297   :  { %v632_v4 = vpack.c.bf16 %v631_v3, %v631_v3 }
 0x299   :  { %v636_v5 = vsel %vm634_vm6, %v632_v4, %v635_v2 }
 0x29a   :  { %637 = vst [vmem:[#allocation3] sm:$0x1] %v636_v5 }
 0x2a0   :  { %v713_v8 = vpop.permute.xlu0 %712 }
 0x2a1   :  { %v755_v6 = vld [vmem:[#allocation3] sm:$0x1]  ;;  %v718_v9 = vrot.slane %v713_v8, %v717_v7 }
 0x2a2   :  { %953 = vmatmul.mubr.msk.bf16.vlgmr.msra.gmra.mxu1 %vm804_vm7, %v755_v6 }
 0x2a3   :  { %v719_v12 = vadd.f32 %v718_v9, %v709_v10 }
 0x2a5   :  { %v738_v14 = vadd.f32 %v736_v13, %v719_v12 }
 0x2a7   :  { %v739_v15 = vmax.f32 %v738_v14, 0.0 }
 0x2a9   :  { %1102 = vrsqrt.f32 %v739_v15  ;;  %vm742_vm8 = vcmp.eq.f32.partialorder %v739_v15, inf  ;;  %v745_v19 = vand.u32 2147483648, %v739_v15  ;;  %vm744_vm9 = vcmp.eq.f32.partialorder %v739_v15, 0.0 }
 0x2b6   :  { %v1103_v16 = vpop.eup %1102 }
 0x2b7   :  { %v741_v17 = vmul.f32 %v1103_v16, %v739_v15 }
 0x2b9   :  { %v743_v18 = vsel %vm742_vm8, %v739_v15, %v741_v17 }
 0x2ba   :  { %v746_v35 = vsel %vm744_vm9, %v745_v19, %v743_v18 }
 0x2bb   :  { %v747_v20 = vmul.f32 1.75, %v746_v35 }
 0x2bd   :  { %v748_v21 = vsub.f32 0.7, %v747_v20 }
 0x2bf   :  { %v944_v22 = vmul.f32 -1.442695, %v748_v21 }
 0x2c1   :  { %1104 = vpow2.f32 %v944_v22 }
 0x2ce   :  { %v1105_v23 = vpop.eup %1104 }
 0x2cf   :  { %v752_v24 = vadd.f32 1.0, %v1105_v23 }
 0x2d1   :  { %1106 = vrcp.f32 %v752_v24 }
 0x2de   :  { %v1107_v36 = vpop.eup %1106 }
 0x362   :  { %v842_v25 = vpop.f32.mrf.mxu1 }
 0x363   :  { %v849_v27 = vmul.f32 0.5, %v842_v25 }
 0x364   :  { %v844_v26 = vpop.f32.mrf.mxu1 }
 0x365   :  { %v850_v28 = vmul.f32 0.5, %v844_v26 }
 0x366   :  { %v846_v30 = vpop.f32.mrf.mxu1 }
 0x367   :  { %v853_v31 = vcombine.low %v849_v27, %v850_v28 }
 0x368   :  { %v847_v32 = vpop.f32.mrf.mxu1 }
 0x369   :  { %v860_v33 = vrot.slane %v853_v31, %v1276_v40 }
 0x36b   :  { %v867_v34 = vrot.slane %v860_v33, %v1276_v40 }
 0x36d   :  { %v869_v37 = vadd.f32 %v1107_v36, %v867_v34 }
 0x36f   :  { %v870_v38 = vadd.f32 1.0, %v869_v37 }
 0x371   :  { %v871_v39 = vmul.f32 0.33333334, %v870_v38 }
 0x373   :  { %876 = vst.msk [vmem:[#allocation5] sm:$0x3] %vm874_vm10, %v871_v39 }
 0x374   :  { %1119 = shalt.err (!%p1116_p4)
}
 0x375   :  { %886 = dma.vmem_to_hbm [thread:$0]  %s884_s22, 32, %s1396_s6, [#allocation6]  }
 0x376   :  { %1128 = dma.done.wait [#allocation6], 32  }
 0x377   :  { %1129 = vsyncadd [#allocation6], 4294967264 }
 0x378   :  { %890 = vsyncpa [#allocation6], 1 }

</bundles_post_ra>
